<compile_context>
chip_gen: v6e
topology: v6e:2x2x1
jax: 0.10.0
libtpu: 0.0.40
codegen_flags: <defaults>
</compile_context>

<pallas_src>
import functools

import jax
import jax.numpy as jnp
from jax.experimental import pallas as pl
from jax.experimental.pallas import tpu as pltpu

NEG_SLOPE = 0.01
LOG_STD_MIN = -20.0
LOG_STD_MAX = 2.0
HIDDEN = 64          # fixed by the PyTorch module
HIDDEN_PAD = 128     # lane-dense padded hidden width


def _leaky_relu(x):
    return jnp.where(x > 0, x, NEG_SLOPE * x)


def _round_up(x, m):
    return (x + m - 1) // m * m


# --------------------------------------------------------------------------- #
# Kernel
# --------------------------------------------------------------------------- #
def policy_kernel(x_ref, w1_ref, b1_ref, w2_ref, b2_ref,
                  wmu_ref, bmu_ref, wstd_ref, bstd_ref,
                  mu_ref, logstd_ref):
    # MXU matmuls with bf16 operands + f32 accumulation; all elementwise math
    # (bias add, leaky_relu, clamp) stays in f32 (v5e VPU has no bf16).
    x = x_ref[...].astype(jnp.bfloat16)

    h1 = jnp.dot(x, w1_ref[...], preferred_element_type=jnp.float32) + b1_ref[...]
    h1 = _leaky_relu(h1)

    h2 = jnp.dot(h1.astype(jnp.bfloat16), w2_ref[...],
                 preferred_element_type=jnp.float32) + b2_ref[...]
    h2 = _leaky_relu(h2)
    h2b = h2.astype(jnp.bfloat16)

    mu = jnp.dot(h2b, wmu_ref[...], preferred_element_type=jnp.float32) + bmu_ref[...]
    mu_ref[...] = mu.astype(mu_ref.dtype)

    log_std = jnp.dot(h2b, wstd_ref[...], preferred_element_type=jnp.float32) + bstd_ref[...]
    logstd_ref[...] = jnp.clip(log_std, LOG_STD_MIN, LOG_STD_MAX).astype(logstd_ref.dtype)


# --------------------------------------------------------------------------- #
# Wrapper
# --------------------------------------------------------------------------- #
def prepare_params(params):
    """One-time plumbing: zero-pad hidden 64 -> 128 (lane-dense intermediates),
    cast weights to bf16 (biases stay f32). Padding is inert: padded W1/b1
    output columns and W2/Wmu/Wstd input rows are exactly zero."""
    action_dim = params["wmu"].shape[1]
    hp = HIDDEN_PAD - HIDDEN

    w1 = jnp.pad(params["w1"], ((0, 0), (0, hp)))
    b1 = jnp.pad(params["b1"], ((0, 0), (0, hp)))
    w2 = jnp.pad(params["w2"], ((0, hp), (0, hp)))
    b2 = jnp.pad(params["b2"], ((0, 0), (0, hp)))
    wmu = jnp.pad(params["wmu"], ((0, hp), (0, 0)))
    wstd = jnp.pad(params["wstd"], ((0, hp), (0, 0)))

    return dict(
        w1=w1.astype(jnp.bfloat16),
        b1=b1.astype(jnp.float32),
        w2=w2.astype(jnp.bfloat16),
        b2=b2.astype(jnp.float32),
        wmu=wmu.astype(jnp.bfloat16),
        bmu=params["bmu"].astype(jnp.float32),
        wstd=wstd.astype(jnp.bfloat16),
        bstd=params["bstd"].astype(jnp.float32),
        action_dim=action_dim,
    )


def policy_forward(x, prep, *, batch_tile=1024):
    """Fused MLP forward. x: (batch, state_dim) float32. Returns (mu, log_std)."""
    batch, state_dim = x.shape
    action_dim = prep["action_dim"]
    hidden = prep["w1"].shape[1]  # padded hidden (128)

    # Batch tile: multiple of 8 sublanes. Small/non-tile-multiple batches use a
    # single grid step sized to the batch (no padding to a 1K tile).
    if batch <= batch_tile:
        tb = _round_up(batch, 8)
        padded_batch = tb
    else:
        tb = batch_tile
        padded_batch = _round_up(batch, tb)
    if padded_batch != batch:
        x = jnp.pad(x, ((0, padded_batch - batch), (0, 0)))

    grid = (padded_batch // tb,)
    resident = lambda i: (0, 0)  # weights/biases stay VMEM-resident across the grid

    flops = 2 * padded_batch * (state_dim * hidden
                                + hidden * hidden
                                + 2 * hidden * action_dim)
    bytes_accessed = (
        padded_batch * state_dim * 4                 # x (f32) read
        + 2 * padded_batch * action_dim * 4          # mu + log_std (f32) write
        + 2 * (state_dim * hidden + hidden * hidden  # bf16 weights
               + 2 * hidden * action_dim)
        + 4 * (2 * hidden + 2 * action_dim)          # f32 biases
    )

    mu, log_std = pl.pallas_call(
        policy_kernel,
        out_shape=(
            jax.ShapeDtypeStruct((padded_batch, action_dim), jnp.float32),
            jax.ShapeDtypeStruct((padded_batch, action_dim), jnp.float32),
        ),
        grid=grid,
        in_specs=[
            pl.BlockSpec((tb, state_dim), lambda i: (i, 0)),    # x tile
            pl.BlockSpec((state_dim, hidden), resident),        # w1
            pl.BlockSpec((1, hidden), resident),                # b1
            pl.BlockSpec((hidden, hidden), resident),           # w2
            pl.BlockSpec((1, hidden), resident),                # b2
            pl.BlockSpec((hidden, action_dim), resident),       # wmu
            pl.BlockSpec((1, action_dim), resident),            # bmu
            pl.BlockSpec((hidden, action_dim), resident),       # wstd
            pl.BlockSpec((1, action_dim), resident),            # bstd
        ],
        out_specs=(
            pl.BlockSpec((tb, action_dim), lambda i: (i, 0)),   # mu tile
            pl.BlockSpec((tb, action_dim), lambda i: (i, 0)),   # log_std tile
        ),
        compiler_params=pltpu.CompilerParams(
            dimension_semantics=("parallel",)),
        cost_estimate=pl.CostEstimate(flops=flops, transcendentals=0,
                                      bytes_accessed=bytes_accessed),
    )(x, prep["w1"], prep["b1"], prep["w2"], prep["b2"],
      prep["wmu"], prep["bmu"], prep["wstd"], prep["bstd"])

    if padded_batch != batch:
        mu = mu[:batch]
        log_std = log_std[:batch]
    return mu, log_std


# --------------------------------------------------------------------------- #
# Init + pure-JAX references
# --------------------------------------------------------------------------- #
def init_params(key, state_dim, hidden, action_dim):
    """nn.Linear-style init (uniform +-1/sqrt(fan_in)); weights stored (in, out)."""
    ks = jax.random.split(key, 8)

    def lin(kw, kb, fan_in, fan_out):
        bound = 1.0 / jnp.sqrt(jnp.float32(fan_in))
        w = jax.random.uniform(kw, (fan_in, fan_out), jnp.float32, -bound, bound)
        b = jax.random.uniform(kb, (1, fan_out), jnp.float32, -bound, bound)
        return w, b

    w1, b1 = lin(ks[0], ks[1], state_dim, hidden)
    w2, b2 = lin(ks[2], ks[3], hidden, hidden)
    wmu, bmu = lin(ks[4], ks[5], hidden, action_dim)
    wstd, bstd = lin(ks[6], ks[7], hidden, action_dim)
    return dict(w1=w1, b1=b1, w2=w2, b2=b2,
                wmu=wmu, bmu=bmu, wstd=wstd, bstd=bstd)


def _bf16_dot(a, b):
    return jnp.dot(a.astype(jnp.bfloat16), b.astype(jnp.bfloat16),
                   preferred_element_type=jnp.float32)


def policy_forward_ref_bf16(x, p):
    """Reference with the same bf16-operand / f32-accumulate matmuls."""
    h1 = _leaky_relu(_bf16_dot(x, p["w1"]) + p["b1"])
    h2 = _leaky_relu(_bf16_dot(h1, p["w2"]) + p["b2"])
    mu = _bf16_dot(h2, p["wmu"]) + p["bmu"]
    log_std = jnp.clip(_bf16_dot(h2, p["wstd"]) + p["bstd"],
                       LOG_STD_MIN, LOG_STD_MAX)
    return mu, log_std


def policy_forward_ref_f32(x, p):
    """Full-precision reference (matches the PyTorch module)."""
    h1 = _leaky_relu(x @ p["w1"] + p["b1"])
    h2 = _leaky_relu(h1 @ p["w2"] + p["b2"])
    mu = h2 @ p["wmu"] + p["bmu"]
    log_std = jnp.clip(h2 @ p["wstd"] + p["bstd"], LOG_STD_MIN, LOG_STD_MAX)
    return mu, log_std


# --------------------------------------------------------------------------- #
# Self-test
# --------------------------------------------------------------------------- #
if __name__ == "__main__":
    key = jax.random.PRNGKey(0)
    k_x, k_p, k_x2 = jax.random.split(key, 3)

    state_dim = 8     # small "state" feature vector
    hidden = HIDDEN   # fixed by the module
    action_dim = 4

    params = init_params(k_p, state_dim, hidden, action_dim)
    prep = prepare_params(params)

    # Small batch (acting-loop shape). NOTE: at batch=2 this call is pure
    # launch/DMA overhead; batch rollouts to amortize it.
    x_small = jax.random.normal(k_x, (2, state_dim), jnp.float32)
    mu, log_std = policy_forward(x_small, prep)
    jax.block_until_ready((mu, log_std))

    mu_bf, ls_bf = policy_forward_ref_bf16(x_small, params)
    mu_f32, ls_f32 = policy_forward_ref_f32(x_small, params)
    assert mu.shape == (2, action_dim) and log_std.shape == (2, action_dim)
    assert jnp.allclose(mu, mu_bf, atol=2e-3, rtol=2e-3)
    assert jnp.allclose(log_std, ls_bf, atol=2e-3, rtol=2e-3)
    assert jnp.allclose(mu, mu_f32, atol=8e-2, rtol=8e-2)
    assert jnp.allclose(log_std, ls_f32, atol=8e-2, rtol=8e-2)

    # Larger, non-tile-multiple batch: now a single 304-row grid step (no 512
    # padding), still exercises the batch-padding/slice path.
    x_big = jax.random.normal(k_x2, (300, state_dim), jnp.float32)
    mu2, ls2 = policy_forward(x_big, prep)
    jax.block_until_ready((mu2, ls2))
    mu2_bf, ls2_bf = policy_forward_ref_bf16(x_big, params)
    assert mu2.shape == (300, action_dim) and ls2.shape == (300, action_dim)
    assert jnp.allclose(mu2, mu2_bf, atol=2e-3, rtol=2e-3)
    assert jnp.allclose(ls2, ls2_bf, atol=2e-3, rtol=2e-3)

    # Multi-tile batch: exercises the grid (>=2 steps -> megacore-shardable).
    x_huge = jax.random.normal(k_x2, (2048 + 128, state_dim), jnp.float32)
    mu3, ls3 = policy_forward(x_huge, prep, batch_tile=1024)
    jax.block_until_ready((mu3, ls3))
    mu3_bf, ls3_bf = policy_forward_ref_bf16(x_huge, params)
    assert mu3.shape == (2176, action_dim) and ls3.shape == (2176, action_dim)
    assert jnp.allclose(mu3, mu3_bf, atol=2e-3, rtol=2e-3)
    assert jnp.allclose(ls3, ls3_bf, atol=2e-3, rtol=2e-3)

    # TODO(synk): `sample()` (Normal rsample + tanh-squash log-prob) and the Adam
    # optimizer are stochastic/training glue; only the deterministic forward
    # hot-path is implemented in-kernel.
    print("KERNEL_OK")
</pallas_src>

<mosaic_0001>
module attributes {stable_mosaic.version = 11 : i64} {
  func.func @policy_kernel(%arg0: i32, %arg1: memref<8x8xf32, #tpu.memory_space<vmem>>, %arg2: memref<8x128xbf16, #tpu.memory_space<vmem>>, %arg3: memref<1x128xf32, #tpu.memory_space<vmem>>, %arg4: memref<128x128xbf16, #tpu.memory_space<vmem>>, %arg5: memref<1x128xf32, #tpu.memory_space<vmem>>, %arg6: memref<128x4xbf16, #tpu.memory_space<vmem>>, %arg7: memref<1x4xf32, #tpu.memory_space<vmem>>, %arg8: memref<128x4xbf16, #tpu.memory_space<vmem>>, %arg9: memref<1x4xf32, #tpu.memory_space<vmem>>, %arg10: memref<8x4xf32, #tpu.memory_space<vmem>>, %arg11: memref<8x4xf32, #tpu.memory_space<vmem>>) attributes {dimension_semantics = [#tpu.dimension_semantics<parallel>], iteration_bounds = array<i64: 1>, scalar_prefetch = 0 : i64, scratch_operands = 0 : i64, tpu.core_type = #tpu.core_type<tc>, window_params = [{transform_indices = @transform_0, window_bounds = array<i64: 8, 8>}, {pipeline_mode = #tpu.pipeline_mode<synchronous>, transform_indices = @transform_1, window_bounds = array<i64: 8, 128>}, {pipeline_mode = #tpu.pipeline_mode<synchronous>, transform_indices = @transform_2, window_bounds = array<i64: 1, 128>}, {pipeline_mode = #tpu.pipeline_mode<synchronous>, transform_indices = @transform_3, window_bounds = array<i64: 128, 128>}, {pipeline_mode = #tpu.pipeline_mode<synchronous>, transform_indices = @transform_4, window_bounds = array<i64: 1, 128>}, {pipeline_mode = #tpu.pipeline_mode<synchronous>, transform_indices = @transform_5, window_bounds = array<i64: 128, 4>}, {pipeline_mode = #tpu.pipeline_mode<synchronous>, transform_indices = @transform_6, window_bounds = array<i64: 1, 4>}, {pipeline_mode = #tpu.pipeline_mode<synchronous>, transform_indices = @transform_7, window_bounds = array<i64: 128, 4>}, {pipeline_mode = #tpu.pipeline_mode<synchronous>, transform_indices = @transform_8, window_bounds = array<i64: 1, 4>}, {transform_indices = @transform_9, window_bounds = array<i64: 8, 4>}, {transform_indices = @transform_10, window_bounds = array<i64: 8, 4>}]} {
    %c0 = arith.constant 0 : index
    %c0_0 = arith.constant 0 : index
    %0 = vector.load %arg1[%c0, %c0_0] : memref<8x8xf32, #tpu.memory_space<vmem>>, vector<8x8xf32>
    %1 = arith.truncf %0 : vector<8x8xf32> to vector<8x8xbf16>
    %c0_1 = arith.constant 0 : index
    %c0_2 = arith.constant 0 : index
    %2 = vector.load %arg2[%c0_1, %c0_2] : memref<8x128xbf16, #tpu.memory_space<vmem>>, vector<8x128xbf16>
    %cst = arith.constant dense<0.000000e+00> : vector<8x128xf32>
    %3 = tpu.matmul %1, %2, %cst {dimension_numbers = #tpu.dot_dimension_numbers<[1], [0], [0], [1], [0, 0, 1, 1], [], []>} : vector<8x8xbf16>, vector<8x128xbf16>, vector<8x128xf32> -> vector<8x128xf32>
    %c0_3 = arith.constant 0 : index
    %c0_4 = arith.constant 0 : index
    %4 = vector.load %arg3[%c0_3, %c0_4] : memref<1x128xf32, #tpu.memory_space<vmem>>, vector<1x128xf32>
    %5 = vector.broadcast %4 : vector<1x128xf32> to vector<8x128xf32>
    %6 = arith.addf %3, %5 : vector<8x128xf32>
    %cst_5 = arith.constant 0.000000e+00 : f32
    %7 = vector.broadcast %cst_5 : f32 to vector<8x128xf32>
    %8 = arith.cmpf ogt, %6, %7 : vector<8x128xf32>
    %cst_6 = arith.constant 0.00999999977 : f32
    %9 = vector.broadcast %cst_6 : f32 to vector<8x128xf32>
    %10 = arith.mulf %9, %6 : vector<8x128xf32>
    %11 = arith.select %8, %6, %10 : vector<8x128xi1>, vector<8x128xf32>
    %12 = arith.truncf %11 : vector<8x128xf32> to vector<8x128xbf16>
    %c0_7 = arith.constant 0 : index
    %c0_8 = arith.constant 0 : index
    %13 = vector.load %arg4[%c0_7, %c0_8] : memref<128x128xbf16, #tpu.memory_space<vmem>>, vector<128x128xbf16>
    %cst_9 = arith.constant dense<0.000000e+00> : vector<8x128xf32>
    %14 = tpu.matmul %12, %13, %cst_9 {dimension_numbers = #tpu.dot_dimension_numbers<[1], [0], [0], [1], [0, 0, 1, 1], [], []>} : vector<8x128xbf16>, vector<128x128xbf16>, vector<8x128xf32> -> vector<8x128xf32>
    %c0_10 = arith.constant 0 : index
    %c0_11 = arith.constant 0 : index
    %15 = vector.load %arg5[%c0_10, %c0_11] : memref<1x128xf32, #tpu.memory_space<vmem>>, vector<1x128xf32>
    %16 = vector.broadcast %15 : vector<1x128xf32> to vector<8x128xf32>
    %17 = arith.addf %14, %16 : vector<8x128xf32>
    %cst_12 = arith.constant 0.000000e+00 : f32
    %18 = vector.broadcast %cst_12 : f32 to vector<8x128xf32>
    %19 = arith.cmpf ogt, %17, %18 : vector<8x128xf32>
    %cst_13 = arith.constant 0.00999999977 : f32
    %20 = vector.broadcast %cst_13 : f32 to vector<8x128xf32>
    %21 = arith.mulf %20, %17 : vector<8x128xf32>
    %22 = arith.select %19, %17, %21 : vector<8x128xi1>, vector<8x128xf32>
    %23 = arith.truncf %22 : vector<8x128xf32> to vector<8x128xbf16>
    %c0_14 = arith.constant 0 : index
    %c0_15 = arith.constant 0 : index
    %24 = vector.load %arg6[%c0_14, %c0_15] : memref<128x4xbf16, #tpu.memory_space<vmem>>, vector<128x4xbf16>
    %cst_16 = arith.constant dense<0.000000e+00> : vector<8x4xf32>
    %25 = tpu.matmul %23, %24, %cst_16 {dimension_numbers = #tpu.dot_dimension_numbers<[1], [0], [0], [1], [0, 0, 1, 1], [], []>} : vector<8x128xbf16>, vector<128x4xbf16>, vector<8x4xf32> -> vector<8x4xf32>
    %c0_17 = arith.constant 0 : index
    %c0_18 = arith.constant 0 : index
    %26 = vector.load %arg7[%c0_17, %c0_18] : memref<1x4xf32, #tpu.memory_space<vmem>>, vector<1x4xf32>
    %27 = vector.broadcast %26 : vector<1x4xf32> to vector<8x4xf32>
    %28 = arith.addf %25, %27 : vector<8x4xf32>
    %c0_19 = arith.constant 0 : index
    %c0_20 = arith.constant 0 : index
    %29 = vector.load %arg10[%c0_19, %c0_20] : memref<8x4xf32, #tpu.memory_space<vmem>>, vector<8x4xf32>
    tpu.vector_store %arg10[%c0_19, %c0_20], %28 {strides = array<i32>} : memref<8x4xf32, #tpu.memory_space<vmem>>, vector<8x4xf32>,
    %c0_21 = arith.constant 0 : index
    %c0_22 = arith.constant 0 : index
    %30 = vector.load %arg8[%c0_21, %c0_22] : memref<128x4xbf16, #tpu.memory_space<vmem>>, vector<128x4xbf16>
    %cst_23 = arith.constant dense<0.000000e+00> : vector<8x4xf32>
    %31 = tpu.matmul %23, %30, %cst_23 {dimension_numbers = #tpu.dot_dimension_numbers<[1], [0], [0], [1], [0, 0, 1, 1], [], []>} : vector<8x128xbf16>, vector<128x4xbf16>, vector<8x4xf32> -> vector<8x4xf32>
    %c0_24 = arith.constant 0 : index
    %c0_25 = arith.constant 0 : index
    %32 = vector.load %arg9[%c0_24, %c0_25] : memref<1x4xf32, #tpu.memory_space<vmem>>, vector<1x4xf32>
    %33 = vector.broadcast %32 : vector<1x4xf32> to vector<8x4xf32>
    %34 = arith.addf %31, %33 : vector<8x4xf32>
    %cst_26 = arith.constant -2.000000e+01 : f32
    %cst_27 = arith.constant 2.000000e+00 : f32
    %35 = vector.broadcast %cst_26 : f32 to vector<8x4xf32>
    %36 = arith.maximumf %35, %34 : vector<8x4xf32>
    %37 = vector.broadcast %cst_27 : f32 to vector<8x4xf32>
    %38 = arith.minimumf %37, %36 : vector<8x4xf32>
    %c0_28 = arith.constant 0 : index
    %c0_29 = arith.constant 0 : index
    %39 = vector.load %arg11[%c0_28, %c0_29] : memref<8x4xf32, #tpu.memory_space<vmem>>, vector<8x4xf32>
    tpu.vector_store %arg11[%c0_28, %c0_29], %38 {strides = array<i32>} : memref<8x4xf32, #tpu.memory_space<vmem>>, vector<8x4xf32>,
    return
  }
  func.func @transform_0(%arg0: i32) -> (i32, i32) {
    %c0_i32 = arith.constant 0 : i32
    %c0_i32_0 = arith.constant 0 : i32
    return %arg0, %c0_i32 : i32, i32
  }
  func.func @transform_1(%arg0: i32) -> (i32, i32) {
    %c0_i32 = arith.constant 0 : i32
    %c0_i32_0 = arith.constant 0 : i32
    %c0_i32_1 = arith.constant 0 : i32
    return %c0_i32, %c0_i32_0 : i32, i32
  }
  func.func @transform_2(%arg0: i32) -> (i32, i32) {
    %c0_i32 = arith.constant 0 : i32
    %c0_i32_0 = arith.constant 0 : i32
    %c0_i32_1 = arith.constant 0 : i32
    return %c0_i32, %c0_i32_0 : i32, i32
  }
  func.func @transform_3(%arg0: i32) -> (i32, i32) {
    %c0_i32 = arith.constant 0 : i32
    %c0_i32_0 = arith.constant 0 : i32
    %c0_i32_1 = arith.constant 0 : i32
    return %c0_i32, %c0_i32_0 : i32, i32
  }
  func.func @transform_4(%arg0: i32) -> (i32, i32) {
    %c0_i32 = arith.constant 0 : i32
    %c0_i32_0 = arith.constant 0 : i32
    %c0_i32_1 = arith.constant 0 : i32
    return %c0_i32, %c0_i32_0 : i32, i32
  }
  func.func @transform_5(%arg0: i32) -> (i32, i32) {
    %c0_i32 = arith.constant 0 : i32
    %c0_i32_0 = arith.constant 0 : i32
    %c0_i32_1 = arith.constant 0 : i32
    return %c0_i32, %c0_i32_0 : i32, i32
  }
  func.func @transform_6(%arg0: i32) -> (i32, i32) {
    %c0_i32 = arith.constant 0 : i32
    %c0_i32_0 = arith.constant 0 : i32
    %c0_i32_1 = arith.constant 0 : i32
    return %c0_i32, %c0_i32_0 : i32, i32
  }
  func.func @transform_7(%arg0: i32) -> (i32, i32) {
    %c0_i32 = arith.constant 0 : i32
    %c0_i32_0 = arith.constant 0 : i32
    %c0_i32_1 = arith.constant 0 : i32
    return %c0_i32, %c0_i32_0 : i32, i32
  }
  func.func @transform_8(%arg0: i32) -> (i32, i32) {
    %c0_i32 = arith.constant 0 : i32
    %c0_i32_0 = arith.constant 0 : i32
    %c0_i32_1 = arith.constant 0 : i32
    return %c0_i32, %c0_i32_0 : i32, i32
  }
  func.func @transform_9(%arg0: i32) -> (i32, i32) {
    %c0_i32 = arith.constant 0 : i32
    %c0_i32_0 = arith.constant 0 : i32
    return %arg0, %c0_i32 : i32, i32
  }
  func.func @transform_10(%arg0: i32) -> (i32, i32) {
    %c0_i32 = arith.constant 0 : i32
    %c0_i32_0 = arith.constant 0 : i32
    return %arg0, %c0_i32 : i32, i32
  }
}

</mosaic_0001>

<bundles_post_ra>
// kernel: tpu_custom_call.1
= control target key start
LH: loop header
LB: loop body
LE: loop exit
PB: predicated region body
PF: predicated region fallthrough
CT: control target
= control target key end

     0   :  { %vm49_vm0 = vcmask 1043456   ;;  %v597_v0 = vmov 0.0   ;;  %vm598_vm1 = vmmov 0   ;;  %vm45_vm2 = vcmask 64512   ;;  %s783_s1 = inlined_call_operand.vmem [shape: bf16[8,128], index: 1, kind: input, shape index: {}]   ;;  %s784_s0 = inlined_call_operand.vmem [shape: f32[8,8], index: 0, kind: input, shape index: {}]   ;;  %s785_s3 = inlined_call_operand.vmem [shape: bf16[128,128], index: 3, kind: input, shape index: {}]   ;;  %s786_s5 = inlined_call_operand.vmem [shape: bf16[128,4], index: 5, kind: input, shape index: {}]   ;;  %s787_s7 = inlined_call_operand.vmem [shape: bf16[128,4], index: 7, kind: input, shape index: {}]   ;;  %s788_s2 = inlined_call_operand.vmem [shape: f32[1,128], index: 2, kind: input, shape index: {}]   ;;  %s789_s4 = inlined_call_operand.vmem [shape: f32[1,128], index: 4, kind: input, shape index: {}]   ;;  %s790_s6 = inlined_call_operand.vmem [shape: f32[1,4], index: 6, kind: input, shape index: {}]   ;;  %s791_s8 = inlined_call_operand.vmem [shape: f32[1,4], index: 8, kind: input, shape index: {}]   ;;  %s792_s9 = inlined_call_operand.vmem [shape: f32[8,4], index: 9, kind: output, shape index: {0}]   ;;  %s793_s10 = inlined_call_operand.vmem [shape: f32[8,4], index: 10, kind: output, shape index: {1}]  }
   0x1   :  { %505 = vmatprep.subr.bf16.mxu0 %v597_v0  ;;  %v37_v1 = vld [vmem:[%s783_s1] sm:$0xf]  ;;  %507 = vmatprep.mubr.msk.bf16.mxu0 %vm598_vm1, %v597_v0  ;;  %v573_v5 = vld [vmem:[%s785_s3 + $0x38] sm:$0xff]   ;;  %v574_v6 = vld [vmem:[%s785_s3 + $0x30] sm:$0xff]   ;;  %vm323_vm5 = vcmask 31744  }
   0x2   :  { %v35_v2 = vld [vmem:[%s784_s0] sm:$0xff]  ;;  %v51_v3 = vsel %vm49_vm0, %v37_v1, 0  ;;  %511 = vmatprep.subr.bf16.mxu1 %v597_v0  ;;  %527 = vmatprep.mubr.msk.bf16.mxu1 %vm598_vm1, %v597_v0  ;;  %v575_v7 = vld [vmem:[%s785_s3 + $0x28] sm:$0xff]   ;;  %v577_v9 = vld [vmem:[%s785_s3 + $0x18] sm:$0xff]  }
   0x3   :  { %v36_v4 = vpack.c.bf16 %v35_v2, %v35_v2  ;;  %506 = vmatpush3.bf16.msra.mxu0 %v51_v3  ;;  %512 = vmatpush3.bf16.msra.mxu1 %v573_v5  ;;  %v576_v8 = vld [vmem:[%s785_s3 + $0x20] sm:$0xff]   ;;  %v578_v10 = vld [vmem:[%s785_s3 + $0x10] sm:$0xff]   ;;  %v579_v11 = vld [vmem:[%s785_s3 + $0x8] sm:$0xff]  }
   0x4   :  { %531 = vmatprep.subr.bf16.mxu0 %v597_v0  ;;  %513 = vmatprep.subr.bf16.mxu1 %v597_v0  ;;  %v580_v12 = vld [vmem:[%s785_s3] sm:$0xff]   ;;  %v581_v13 = vld [vmem:[%s786_s5 + $0x38] sm:$0xff]   ;;  %v583_v14 = vld [vmem:[%s786_s5 + $0x30] sm:$0xff]  }
   0x5   :  { %v585_v15 = vld [vmem:[%s786_s5 + $0x28] sm:$0xff]   ;;  %v587_v16 = vld [vmem:[%s786_s5 + $0x20] sm:$0xff]   ;;  %v589_v17 = vld [vmem:[%s786_s5 + $0x18] sm:$0xff]  }
   0x6   :  { %508 = vmatmul.mubr.msk.bf16.vlgmr.msra.gmra.mxu0 %vm45_vm2, %v36_v4  ;;  %v591_v18 = vld [vmem:[%s786_s5 + $0x10] sm:$0xff]   ;;  %v447_v19 = vld [vmem:[%s788_s2] ss:$0 sm:$0xff]  ;;  %v582_v26 = vld [vmem:[%s787_s7 + $0x38] sm:$0xff]  }
   0x7   :  { %547 = vmatprep.mubr.msk.bf16.mxu0 %vm598_vm1, %v597_v0  ;;  %514 = vmatpush3.bf16.msra.mxu1 %v574_v6  ;;  %v584_v29 = vld [vmem:[%s787_s7 + $0x30] sm:$0xff]   ;;  %v586_v30 = vld [vmem:[%s787_s7 + $0x28] sm:$0xff]   ;;  %v588_v31 = vld [vmem:[%s787_s7 + $0x20] sm:$0xff]  }
   0x8   :  { %515 = vmatprep.subr.bf16.mxu1 %v597_v0  ;;  %532 = vmatpush3.bf16.msra.mxu0 %v581_v13  ;;  %v590_v32 = vld [vmem:[%s787_s7 + $0x18] sm:$0xff]   ;;  %v592_v33 = vld [vmem:[%s787_s7 + $0x10] sm:$0xff]   ;;  %v593_v34 = vld [vmem:[%s786_s5 + $0x8] sm:$0xff]  }
   0x9   :  { %533 = vmatprep.subr.bf16.mxu0 %v597_v0  ;;  %v594_v35 = vld [vmem:[%s787_s7 + $0x8] sm:$0xff]   ;;  %v595_v36 = vld [vmem:[%s786_s5] sm:$0xff]  }
   0xa   :  { %v596_v37 = vld [vmem:[%s787_s7] sm:$0xff]  }
   0xb   :  { %516 = vmatpush3.bf16.msra.mxu1 %v575_v7  ;;  %v449_v38 = vld [vmem:[%s789_s4] ss:$0 sm:$0xff] }
   0xc   :  { %517 = vmatprep.subr.bf16.mxu1 %v597_v0  ;;  %534 = vmatpush3.bf16.msra.mxu0 %v583_v14  ;;  %v458_v47 = vld [vmem:[%s790_s6] ss:$0 sm:$0xff] }
   0xd   :  { %535 = vmatprep.subr.bf16.mxu0 %v597_v0  ;;  %v467_v48 = vld [vmem:[%s791_s8] ss:$0 sm:$0xff] }
   0xf   :  { %518 = vmatpush3.bf16.msra.mxu1 %v576_v8 }
  0x10   :  { %519 = vmatprep.subr.bf16.mxu1 %v597_v0  ;;  %536 = vmatpush3.bf16.msra.mxu0 %v585_v15 }
  0x11   :  { %537 = vmatprep.subr.bf16.mxu0 %v597_v0 }
  0x13   :  { %520 = vmatpush3.bf16.msra.mxu1 %v577_v9 }
  0x14   :  { %521 = vmatprep.subr.bf16.mxu1 %v597_v0  ;;  %538 = vmatpush3.bf16.msra.mxu0 %v587_v16 }
  0x15   :  { %539 = vmatprep.subr.bf16.mxu0 %v597_v0 }
  0x17   :  { %522 = vmatpush3.bf16.msra.mxu1 %v578_v10 }
  0x18   :  { %523 = vmatprep.subr.bf16.mxu1 %v597_v0  ;;  %540 = vmatpush3.bf16.msra.mxu0 %v589_v17 }
  0x19   :  { %541 = vmatprep.subr.bf16.mxu0 %v597_v0 }
  0x1b   :  { %524 = vmatpush3.bf16.msra.mxu1 %v579_v11 }
  0x1c   :  { %525 = vmatprep.subr.bf16.mxu1 %v597_v0  ;;  %542 = vmatpush3.bf16.msra.mxu0 %v591_v18 }
  0x1d   :  { %543 = vmatprep.subr.bf16.mxu0 %v597_v0 }
  0x1f   :  { %526 = vmatpush3.bf16.msra.mxu1 %v580_v12 }
  0x20   :  { %551 = vmatprep.subr.bf16.mxu1 %v597_v0  ;;  %544 = vmatpush3.bf16.msra.mxu0 %v593_v34 }
  0x21   :  { %545 = vmatprep.subr.bf16.mxu0 %v597_v0 }
  0x24   :  { %546 = vmatpush3.bf16.msra.mxu0 %v595_v36 }
  0xc6   :  { %v87_v20 = vpop.f32.mrf.mxu0 }
  0xc7   :  { %v88_v21 = vadd.f32 %v447_v19, %v87_v20 }
  0xc8   :  { %v509_v22 = vpop.f32.mrf.mxu0 }
  0xc9   :  { %vm93_vm3 = vcmp.gt.f32.partialorder %v88_v21, 0.0  ;;  %v94_v23 = vmul.f32 0.01, %v88_v21 }
  0xca   :  { %v90_v24 = vpop.f32.mrf.mxu0 }
  0xcb   :  { %v95_v25 = vsel %vm93_vm3, %v88_v21, %v94_v23 }
  0xcc   :  { %v510_v27 = vpop.f32.mrf.mxu0  ;;  %v96_v28 = vpack.c.bf16 %v95_v25, %v95_v25 }
  0xce   :  { %528 = vmatmul.mubr.bf16.vlgmr.msra.gmra.mxu1 %v96_v28 }
  0xcf   :  { %552 = vmatpush3.bf16.msra.mxu1 %v582_v26  ;;  %567 = vmatprep.mubr.msk.bf16.mxu1 %vm598_vm1, %v597_v0 }
  0xd0   :  { %553 = vmatprep.subr.bf16.mxu1 %v597_v0 }
  0xd3   :  { %554 = vmatpush3.bf16.msra.mxu1 %v584_v29 }
  0xd4   :  { %555 = vmatprep.subr.bf16.mxu1 %v597_v0 }
  0xd7   :  { %556 = vmatpush3.bf16.msra.mxu1 %v586_v30 }
  0xd8   :  { %557 = vmatprep.subr.bf16.mxu1 %v597_v0 }
  0xdb   :  { %558 = vmatpush3.bf16.msra.mxu1 %v588_v31 }
  0xdc   :  { %559 = vmatprep.subr.bf16.mxu1 %v597_v0 }
  0xdf   :  { %560 = vmatpush3.bf16.msra.mxu1 %v590_v32 }
  0xe0   :  { %561 = vmatprep.subr.bf16.mxu1 %v597_v0 }
  0xe3   :  { %562 = vmatpush3.bf16.msra.mxu1 %v592_v33 }
  0xe4   :  { %563 = vmatprep.subr.bf16.mxu1 %v597_v0 }
  0xe7   :  { %564 = vmatpush3.bf16.msra.mxu1 %v594_v35 }
  0xe8   :  { %565 = vmatprep.subr.bf16.mxu1 %v597_v0 }
  0xeb   :  { %566 = vmatpush3.bf16.msra.mxu1 %v596_v37 }
 0x18e   :  { %v202_v39 = vpop.f32.mrf.mxu1 }
 0x18f   :  { %v203_v40 = vadd.f32 %v449_v38, %v202_v39 }
 0x190   :  { %v529_v41 = vpop.f32.mrf.mxu1 }
 0x191   :  { %vm208_vm4 = vcmp.gt.f32.partialorder %v203_v40, 0.0  ;;  %v209_v42 = vmul.f32 0.01, %v203_v40 }
 0x192   :  { %v205_v43 = vpop.f32.mrf.mxu1 }
 0x193   :  { %v210_v44 = vsel %vm208_vm4, %v203_v40, %v209_v42 }
 0x194   :  { %v211_v45 = vpack.c.bf16 %v210_v44, %v210_v44  ;;  %v530_v46 = vpop.f32.mrf.mxu1 }
 0x196   :  { %548 = vmatmul.mubr.bf16.vlgmr.msra.gmra.mxu0 %v211_v45  ;;  %568 = vmatmul.mubr.bf16.vlgmr.msra.gmra.mxu1 %v211_v45 }
 0x256   :  { %v317_v49 = vpop.f32.mrf.mxu0  ;;  %v430_v50 = vpop.f32.mrf.mxu1 }
 0x257   :  { %v318_v51 = vadd.f32 %v458_v47, %v317_v49  ;;  %v431_v52 = vadd.f32 %v467_v48, %v430_v50 }
 0x258   :  { %v549_v53 = vpop.f32.mrf.mxu0  ;;  %v569_v54 = vpop.f32.mrf.mxu1 }
 0x259   :  { %324 = vst.msk [vmem:[%s792_s9] sm:$0xff] %vm323_vm5, %v318_v51  ;;  %v436_v55 = vmax.f32 %v431_v52, -20.0 }
 0x25a   :  { %v320_v56 = vpop.f32.mrf.mxu0  ;;  %v433_v57 = vpop.f32.mrf.mxu1 }
 0x25b   :  { %v437_v58 = vmin.f32 %v436_v55, 2.0 }
 0x25c   :  { %v550_v59 = vpop.f32.mrf.mxu0  ;;  %v570_v60 = vpop.f32.mrf.mxu1 }
 0x25d   :  { %438 = vst.msk [vmem:[%s793_s10] sm:$0xff] %vm323_vm5, %v437_v58 }

</bundles_post_ra>
